<compile_context>
chip_gen: v5e
topology: v5e:2x2
jax: 0.10.0
libtpu: 0.0.40
codegen_flags: <defaults>
</compile_context>

<pallas_src>
import math

import jax
import jax.numpy as jnp
from jax.experimental import pallas as pl
from jax.experimental.pallas import tpu as pltpu  # noqa: F401  (TPU backend assumed)

# Small, forward-consistent shapes.
B, S, H = 2, 8, 32
NUM_HEADS = 4
HEAD_DIM = H // NUM_HEADS
RANK = H            # see NOTE above
ROWS = B * S        # 16 flattened rows
QKV_PAD = 128       # fused projection width: 3*H = 96, zero-padded to a full lane tile
NEG_INF = -1e9


def lora_attn_kernel(x_ref, mask_ref, w_ref, b_ref, out_ref):
    """Single grid-less invocation; whole problem resident in VMEM.

    x_ref   : [ROWS, H]        flattened hidden states
    mask_ref: [ROWS, ROWS]     additive mask (HF mask + cross-batch block mask)
    w_ref   : [H, QKV_PAD]     fused (LoRA-folded, pre-transposed, q-scaled) QKV weights
    b_ref   : [1, QKV_PAD]     fused bias (zero-padded)
    out_ref : [ROWS, H]
    """
    x = x_ref[...]                                                       # [16, 32]

    # One fused projection: q|k|v live in lanes [0:32), [32:64), [64:96); 96:128 zero.
    qkv = jnp.dot(x, w_ref[...], preferred_element_type=jnp.float32) + b_ref[...]

    mask = mask_ref[...]                                                 # [16, 16]

    # Per-head attention over the flat B*S rows; cross-batch score terms are killed
    # by the precomputed block mask.  NUM_HEADS is small -> static unroll.
    outs = []
    for h in range(NUM_HEADS):
        q_h = qkv[:, h * HEAD_DIM:(h + 1) * HEAD_DIM]                   # [16, 8]
        k_h = qkv[:, H + h * HEAD_DIM:H + (h + 1) * HEAD_DIM]           # [16, 8]
        v_h = qkv[:, 2 * H + h * HEAD_DIM:2 * H + (h + 1) * HEAD_DIM]   # [16, 8]

        s = jnp.einsum('qd,kd->qk', q_h, k_h,
                       preferred_element_type=jnp.float32) + mask       # scale is in q
        m = jnp.max(s, axis=-1, keepdims=True)
        e = jnp.exp(s - m)
        p = e / jnp.sum(e, axis=-1, keepdims=True)   # exact divide (cheap at [16,16])
        outs.append(jnp.dot(p, v_h, preferred_element_type=jnp.float32))

    # One store of the full flat [B*S, H] tile.
    out_ref[...] = jnp.concatenate(outs, axis=-1).astype(out_ref.dtype)


def lora_attention(x, mask, params):
    """x: [B,S,H] f32, mask: [B,1,S] additive f32, params: raw module weights."""
    wq, bq, wk, bk, wv, bv, lq, lk, lv = params
    # Host-side fold q + q @ Lq^T = q @ (I + Lq^T) is exact only for rank == hidden.
    assert lq.shape == (H, H) and lk.shape == (H, H) and lv.shape == (H, H), \
        "LoRA fold requires rank == hidden_size (matches the PyTorch module's constraint)"

    eye = jnp.eye(H, dtype=jnp.float32)
    scale = 1.0 / math.sqrt(HEAD_DIM)
    # Effective weights in [in, out] layout; softmax scale folded into the q projection.
    wq_eff = (wq.T @ (eye + lq.T)) * scale
    bq_eff = (bq @ (eye + lq.T)) * scale
    wk_eff = wk.T @ (eye + lk.T)
    bk_eff = bk @ (eye + lk.T)
    wv_eff = wv.T @ (eye + lv.T)
    bv_eff = bv @ (eye + lv.T)

    # Fuse QKV into a single [H, 3H] matmul, zero-padded to a lane-dense 128 columns.
    w_qkv = jnp.concatenate([wq_eff, wk_eff, wv_eff], axis=1)            # [H, 3H]
    b_qkv = jnp.concatenate([bq_eff, bk_eff, bv_eff], axis=1)            # [1, 3H]
    w_qkv = jnp.pad(w_qkv, ((0, 0), (0, QKV_PAD - 3 * H)))
    b_qkv = jnp.pad(b_qkv, ((0, 0), (0, QKV_PAD - 3 * H)))

    # Flat [B*S, B*S] additive mask: HF mask inside each batch block, -1e9 outside
    # (kills the cross-batch scores introduced by flattening B into rows).
    attn = jnp.broadcast_to(mask, (B, S, S))                             # [B, S, S]
    mask2d = jnp.full((ROWS, ROWS), NEG_INF, dtype=jnp.float32)
    for b in range(B):
        mask2d = mask2d.at[b * S:(b + 1) * S, b * S:(b + 1) * S].set(attn[b])

    x2d = x.reshape(ROWS, H)

    # No grid: the whole (tiny) problem fits in VMEM for a single kernel step; a grid
    # would only add ~0.35 us/step overhead.  (At production shapes: grid over row
    # tiles marked "parallel" for v7x's 2 TCs, bf16 MXU inputs for v6e/v5e.)
    out2d = pl.pallas_call(
        lora_attn_kernel,
        out_shape=jax.ShapeDtypeStruct((ROWS, H), jnp.float32),
    )(x2d, mask2d, w_qkv, b_qkv)
    return out2d.reshape(B, S, H)


def reference(x, mask, params):
    """Pure-JAX reference of the original (unfused) forward, for correctness check."""
    wq, bq, wk, bk, wv, bv, lq, lk, lv = params
    q = x @ wq.T + bq
    k = x @ wk.T + bk
    v = x @ wv.T + bv
    q = q + q @ lq.T
    k = k + k @ lk.T
    v = v + v @ lv.T

    def split(t):
        return t.reshape(B, S, NUM_HEADS, HEAD_DIM).transpose(0, 2, 1, 3)

    qh, kh, vh = split(q), split(k), split(v)
    s = jnp.einsum('bhqd,bhkd->bhqk', qh, kh) / math.sqrt(HEAD_DIM)
    s = s + mask[:, :, None, :]                   # [B,1,S] -> [B,1,1,S]
    p = jax.nn.softmax(s, axis=-1)
    o = jnp.einsum('bhqk,bhkd->bhqd', p, vh)
    return o.transpose(0, 2, 1, 3).reshape(B, S, H)


if __name__ == "__main__":
    key = jax.random.PRNGKey(0)
    keys = jax.random.split(key, 11)
    bound = 1.0 / math.sqrt(H)   # PyTorch nn.Linear default init bound

    wq = jax.random.uniform(keys[0], (H, H), jnp.float32, -bound, bound)
    bq = jax.random.uniform(keys[1], (1, H), jnp.float32, -bound, bound)
    wk = jax.random.uniform(keys[2], (H, H), jnp.float32, -bound, bound)
    bk = jax.random.uniform(keys[3], (1, H), jnp.float32, -bound, bound)
    wv = jax.random.uniform(keys[4], (H, H), jnp.float32, -bound, bound)
    bv = jax.random.uniform(keys[5], (1, H), jnp.float32, -bound, bound)
    # LoRA weights: normal(mean=0, std=0.02), bias-free, shape [rank, in_dim]
    lq = 0.02 * jax.random.normal(keys[6], (RANK, H), jnp.float32)
    lk = 0.02 * jax.random.normal(keys[7], (RANK, H), jnp.float32)
    lv = 0.02 * jax.random.normal(keys[8], (RANK, H), jnp.float32)
    params = (wq, bq, wk, bk, wv, bv, lq, lk, lv)

    x = jax.random.normal(keys[9], (B, S, H), jnp.float32)
    # Additive attention mask [B, 1, S]: 0 = attend, -1e9 = masked (HF convention).
    mask = jnp.zeros((B, 1, S), jnp.float32)
    mask = mask.at[1, 0, S - 1].set(NEG_INF)         # mask last token of batch 1

    out = lora_attention(x, mask, params)
    out = jax.block_until_ready(out)

    ref = reference(x, mask, params)
    assert out.shape == (B, S, H)
    # Exact-divide softmax; remaining error is host-side weight-fold reassociation.
    assert jnp.allclose(out, ref, atol=1e-4, rtol=1e-4), "mismatch vs pure-JAX reference"
    print("KERNEL_OK")
</pallas_src>

<mosaic_0001>
module attributes {stable_mosaic.version = 11 : i64} {
  func.func @lora_attn_kernel(%arg0: memref<16x32xf32, #tpu.memory_space<vmem>>, %arg1: memref<16x16xf32, #tpu.memory_space<vmem>>, %arg2: memref<32x128xf32, #tpu.memory_space<vmem>>, %arg3: memref<1x128xf32, #tpu.memory_space<vmem>>, %arg4: memref<16x32xf32, #tpu.memory_space<vmem>>) attributes {dimension_semantics = [], scalar_prefetch = 0 : i64, scratch_operands = 0 : i64, tpu.core_type = #tpu.core_type<tc>} {
    %c0 = arith.constant 0 : index
    %c0_0 = arith.constant 0 : index
    %0 = vector.load %arg0[%c0, %c0_0] : memref<16x32xf32, #tpu.memory_space<vmem>>, vector<16x32xf32>
    %c0_1 = arith.constant 0 : index
    %c0_2 = arith.constant 0 : index
    %1 = vector.load %arg2[%c0_1, %c0_2] : memref<32x128xf32, #tpu.memory_space<vmem>>, vector<32x128xf32>
    %cst = arith.constant dense<0.000000e+00> : vector<16x128xf32>
    %2 = tpu.matmul %0, %1, %cst {dimension_numbers = #tpu.dot_dimension_numbers<[1], [0], [0], [1], [0, 0, 1, 1], [], []>} : vector<16x32xf32>, vector<32x128xf32>, vector<16x128xf32> -> vector<16x128xf32>
    %c0_3 = arith.constant 0 : index
    %c0_4 = arith.constant 0 : index
    %3 = vector.load %arg3[%c0_3, %c0_4] : memref<1x128xf32, #tpu.memory_space<vmem>>, vector<1x128xf32>
    %4 = vector.broadcast %3 : vector<1x128xf32> to vector<16x128xf32>
    %5 = arith.addf %2, %4 : vector<16x128xf32>
    %c0_5 = arith.constant 0 : index
    %c0_6 = arith.constant 0 : index
    %6 = vector.load %arg1[%c0_5, %c0_6] : memref<16x16xf32, #tpu.memory_space<vmem>>, vector<16x16xf32>
    %7 = vector.extract_strided_slice %5 {offsets = [0, 0], sizes = [16, 8], strides = [1, 1]} : vector<16x128xf32> to vector<16x8xf32>
    %8 = vector.extract_strided_slice %5 {offsets = [0, 32], sizes = [16, 8], strides = [1, 1]} : vector<16x128xf32> to vector<16x8xf32>
    %9 = vector.extract_strided_slice %5 {offsets = [0, 64], sizes = [16, 8], strides = [1, 1]} : vector<16x128xf32> to vector<16x8xf32>
    "tpu.trace_start"() <{level = 10 : i32, message = "qd,kd->qk"}> : () -> ()
    %cst_7 = arith.constant dense<0.000000e+00> : vector<16x16xf32>
    %10 = tpu.matmul %7, %8, %cst_7 {dimension_numbers = #tpu.dot_dimension_numbers<[1], [1], [0], [0], [0, 0, 1, 0], [], []>} : vector<16x8xf32>, vector<16x8xf32>, vector<16x16xf32> -> vector<16x16xf32>
    "tpu.trace_stop"() : () -> ()
    %11 = arith.addf %10, %6 : vector<16x16xf32>
    %cst_8 = arith.constant dense<0xFF800000> : vector<16xf32>
    %12 = vector.multi_reduction <maximumf>, %11, %cst_8 [1] : vector<16x16xf32> to vector<16xf32>
    %13 = vector.shape_cast %12 : vector<16xf32> to vector<16x1xf32>
    %14 = vector.broadcast %13 : vector<16x1xf32> to vector<16x16xf32>
    %15 = arith.subf %11, %14 : vector<16x16xf32>
    %16 = math.exp %15 : vector<16x16xf32>
    %cst_9 = arith.constant dense<0.000000e+00> : vector<16xf32>
    %17 = vector.multi_reduction <add>, %16, %cst_9 [1] : vector<16x16xf32> to vector<16xf32>
    %18 = vector.shape_cast %17 : vector<16xf32> to vector<16x1xf32>
    %19 = vector.broadcast %18 : vector<16x1xf32> to vector<16x16xf32>
    %20 = arith.divf %16, %19 : vector<16x16xf32>
    %cst_10 = arith.constant dense<0.000000e+00> : vector<16x8xf32>
    %21 = tpu.matmul %20, %9, %cst_10 {dimension_numbers = #tpu.dot_dimension_numbers<[1], [0], [0], [1], [0, 0, 1, 1], [], []>} : vector<16x16xf32>, vector<16x8xf32>, vector<16x8xf32> -> vector<16x8xf32>
    %22 = vector.extract_strided_slice %5 {offsets = [0, 8], sizes = [16, 8], strides = [1, 1]} : vector<16x128xf32> to vector<16x8xf32>
    %23 = vector.extract_strided_slice %5 {offsets = [0, 40], sizes = [16, 8], strides = [1, 1]} : vector<16x128xf32> to vector<16x8xf32>
    %24 = vector.extract_strided_slice %5 {offsets = [0, 72], sizes = [16, 8], strides = [1, 1]} : vector<16x128xf32> to vector<16x8xf32>
    "tpu.trace_start"() <{level = 10 : i32, message = "qd,kd->qk"}> : () -> ()
    %cst_11 = arith.constant dense<0.000000e+00> : vector<16x16xf32>
    %25 = tpu.matmul %22, %23, %cst_11 {dimension_numbers = #tpu.dot_dimension_numbers<[1], [1], [0], [0], [0, 0, 1, 0], [], []>} : vector<16x8xf32>, vector<16x8xf32>, vector<16x16xf32> -> vector<16x16xf32>
    "tpu.trace_stop"() : () -> ()
    %26 = arith.addf %25, %6 : vector<16x16xf32>
    %cst_12 = arith.constant dense<0xFF800000> : vector<16xf32>
    %27 = vector.multi_reduction <maximumf>, %26, %cst_12 [1] : vector<16x16xf32> to vector<16xf32>
    %28 = vector.shape_cast %27 : vector<16xf32> to vector<16x1xf32>
    %29 = vector.broadcast %28 : vector<16x1xf32> to vector<16x16xf32>
    %30 = arith.subf %26, %29 : vector<16x16xf32>
    %31 = math.exp %30 : vector<16x16xf32>
    %cst_13 = arith.constant dense<0.000000e+00> : vector<16xf32>
    %32 = vector.multi_reduction <add>, %31, %cst_13 [1] : vector<16x16xf32> to vector<16xf32>
    %33 = vector.shape_cast %32 : vector<16xf32> to vector<16x1xf32>
    %34 = vector.broadcast %33 : vector<16x1xf32> to vector<16x16xf32>
    %35 = arith.divf %31, %34 : vector<16x16xf32>
    %cst_14 = arith.constant dense<0.000000e+00> : vector<16x8xf32>
    %36 = tpu.matmul %35, %24, %cst_14 {dimension_numbers = #tpu.dot_dimension_numbers<[1], [0], [0], [1], [0, 0, 1, 1], [], []>} : vector<16x16xf32>, vector<16x8xf32>, vector<16x8xf32> -> vector<16x8xf32>
    %37 = vector.extract_strided_slice %5 {offsets = [0, 16], sizes = [16, 8], strides = [1, 1]} : vector<16x128xf32> to vector<16x8xf32>
    %38 = vector.extract_strided_slice %5 {offsets = [0, 48], sizes = [16, 8], strides = [1, 1]} : vector<16x128xf32> to vector<16x8xf32>
    %39 = vector.extract_strided_slice %5 {offsets = [0, 80], sizes = [16, 8], strides = [1, 1]} : vector<16x128xf32> to vector<16x8xf32>
    "tpu.trace_start"() <{level = 10 : i32, message = "qd,kd->qk"}> : () -> ()
    %cst_15 = arith.constant dense<0.000000e+00> : vector<16x16xf32>
    %40 = tpu.matmul %37, %38, %cst_15 {dimension_numbers = #tpu.dot_dimension_numbers<[1], [1], [0], [0], [0, 0, 1, 0], [], []>} : vector<16x8xf32>, vector<16x8xf32>, vector<16x16xf32> -> vector<16x16xf32>
    "tpu.trace_stop"() : () -> ()
    %41 = arith.addf %40, %6 : vector<16x16xf32>
    %cst_16 = arith.constant dense<0xFF800000> : vector<16xf32>
    %42 = vector.multi_reduction <maximumf>, %41, %cst_16 [1] : vector<16x16xf32> to vector<16xf32>
    %43 = vector.shape_cast %42 : vector<16xf32> to vector<16x1xf32>
    %44 = vector.broadcast %43 : vector<16x1xf32> to vector<16x16xf32>
    %45 = arith.subf %41, %44 : vector<16x16xf32>
    %46 = math.exp %45 : vector<16x16xf32>
    %cst_17 = arith.constant dense<0.000000e+00> : vector<16xf32>
    %47 = vector.multi_reduction <add>, %46, %cst_17 [1] : vector<16x16xf32> to vector<16xf32>
    %48 = vector.shape_cast %47 : vector<16xf32> to vector<16x1xf32>
    %49 = vector.broadcast %48 : vector<16x1xf32> to vector<16x16xf32>
    %50 = arith.divf %46, %49 : vector<16x16xf32>
    %cst_18 = arith.constant dense<0.000000e+00> : vector<16x8xf32>
    %51 = tpu.matmul %50, %39, %cst_18 {dimension_numbers = #tpu.dot_dimension_numbers<[1], [0], [0], [1], [0, 0, 1, 1], [], []>} : vector<16x16xf32>, vector<16x8xf32>, vector<16x8xf32> -> vector<16x8xf32>
    %52 = vector.extract_strided_slice %5 {offsets = [0, 24], sizes = [16, 8], strides = [1, 1]} : vector<16x128xf32> to vector<16x8xf32>
    %53 = vector.extract_strided_slice %5 {offsets = [0, 56], sizes = [16, 8], strides = [1, 1]} : vector<16x128xf32> to vector<16x8xf32>
    %54 = vector.extract_strided_slice %5 {offsets = [0, 88], sizes = [16, 8], strides = [1, 1]} : vector<16x128xf32> to vector<16x8xf32>
    "tpu.trace_start"() <{level = 10 : i32, message = "qd,kd->qk"}> : () -> ()
    %cst_19 = arith.constant dense<0.000000e+00> : vector<16x16xf32>
    %55 = tpu.matmul %52, %53, %cst_19 {dimension_numbers = #tpu.dot_dimension_numbers<[1], [1], [0], [0], [0, 0, 1, 0], [], []>} : vector<16x8xf32>, vector<16x8xf32>, vector<16x16xf32> -> vector<16x16xf32>
    "tpu.trace_stop"() : () -> ()
    %56 = arith.addf %55, %6 : vector<16x16xf32>
    %cst_20 = arith.constant dense<0xFF800000> : vector<16xf32>
    %57 = vector.multi_reduction <maximumf>, %56, %cst_20 [1] : vector<16x16xf32> to vector<16xf32>
    %58 = vector.shape_cast %57 : vector<16xf32> to vector<16x1xf32>
    %59 = vector.broadcast %58 : vector<16x1xf32> to vector<16x16xf32>
    %60 = arith.subf %56, %59 : vector<16x16xf32>
    %61 = math.exp %60 : vector<16x16xf32>
    %cst_21 = arith.constant dense<0.000000e+00> : vector<16xf32>
    %62 = vector.multi_reduction <add>, %61, %cst_21 [1] : vector<16x16xf32> to vector<16xf32>
    %63 = vector.shape_cast %62 : vector<16xf32> to vector<16x1xf32>
    %64 = vector.broadcast %63 : vector<16x1xf32> to vector<16x16xf32>
    %65 = arith.divf %61, %64 : vector<16x16xf32>
    %cst_22 = arith.constant dense<0.000000e+00> : vector<16x8xf32>
    %66 = tpu.matmul %65, %54, %cst_22 {dimension_numbers = #tpu.dot_dimension_numbers<[1], [0], [0], [1], [0, 0, 1, 1], [], []>} : vector<16x16xf32>, vector<16x8xf32>, vector<16x8xf32> -> vector<16x8xf32>
    %67 = tpu.concatenate %21, %36, %51, %66 in 1 : vector<16x8xf32>, vector<16x8xf32>, vector<16x8xf32>, vector<16x8xf32> -> vector<16x32xf32>
    %c0_23 = arith.constant 0 : index
    %c0_24 = arith.constant 0 : index
    %68 = vector.load %arg4[%c0_23, %c0_24] : memref<16x32xf32, #tpu.memory_space<vmem>>, vector<16x32xf32>
    tpu.vector_store %arg4[%c0_23, %c0_24], %67 {strides = array<i32>} : memref<16x32xf32, #tpu.memory_space<vmem>>, vector<16x32xf32>,
    return
  }
}

</mosaic_0001>

<bundles_post_ra>
// kernel: tpu_custom_call.1
= control target key start
LH: loop header
LB: loop body
LE: loop exit
PB: predicated region body
PF: predicated region fallthrough
CT: control target
= control target key end

     0   :  { %9 = vsyncpa [#allocation3], 0  ;;  %s1051_s0 = inlined_call_operand.hbm [shape: f32[16,32], index: 0, kind: input, shape index: {}]   ;;  %s1052_s1 = inlined_call_operand.hbm [shape: f32[16,16], index: 1, kind: input, shape index: {}]   ;;  %s1053_s2 = inlined_call_operand.hbm [shape: f32[32,128], index: 2, kind: input, shape index: {}]   ;;  %s1054_s3 = inlined_call_operand.vmem [shape: f32[1,128], index: 3, kind: input, shape index: {}]   ;;  %s1055_s4 = inlined_call_operand.hbm [shape: f32[16,32], index: 4, kind: output, shape index: {}]  }
   0x1   :  { %10 = vsyncpa [#allocation6], 0 }
   0x2   :  { %11 = vsyncpa [#allocation4], 0  ;;  %s29_s17 = sshll.u32 %s1052_s1, 4  ;;  %s850_s18 = smov [#allocation5]   ;;  %s30_s17 = int_to_ptr.hbm [resolvable:$true] %s29_s17 }
   0x3   :  { %s31_s19 = sshll.u32 %s850_s18, 4  ;;  %s16_s22 = sshll.u32 %s1051_s0, 4  ;;  %s32_s19 = int_to_ptr.vmem [resolvable:$true] %s31_s19  ;;  %s17_s22 = int_to_ptr.hbm [resolvable:$true] %s16_s22 }
   0x4   :  { %s851_s23 = smov 128   ;;  %s852_s24 = smov 8  }
   0x5   :  { %37 = dma.hbm_to_vmem [thread:$0]  %s30_s17, 256, %s32_s19, [#allocation6], %s851_s23, %s851_s23, %s852_s24  }
   0x6   :  { %s853_s25 = smov [#allocation2]   ;;  %s42_s1 = sshll.u32 %s1053_s2, 4  ;;  %s43_s1 = int_to_ptr.hbm [resolvable:$true] %s42_s1 }
   0x7   :  { %s18_s26 = sshll.u32 %s853_s25, 4  ;;  %s854_s0 = smov [#allocation7]   ;;  %s19_s26 = int_to_ptr.vmem [resolvable:$true] %s18_s26 }
   0x8   :  { %24 = dma.hbm_to_vmem [thread:$0]  %s17_s22, 256, %s19_s26, [#allocation3], %s851_s23, %s851_s23, %s852_s24  }
   0x9   :  { %s44_s29 = sshll.u32 %s854_s0, 4  ;;  %s45_s29 = int_to_ptr.vmem [resolvable:$true] %s44_s29 }
   0xa   :  { %50 = dma.hbm_to_vmem [thread:$0]  %s43_s1, 512, %s45_s29, [#allocation6], %s851_s23, %s851_s23, %s852_s24  }
   0xb   :  { %844 = dma.done.wait [#allocation3], 256  }
   0xc   :  { %845 = vsyncadd [#allocation3], 4294967040 }
   0xd   :  { %846 = dma.done.wait [#allocation6], 768  }
   0xe   :  { %847 = vsyncadd [#allocation6], 4294966528  ;;  %v70_v0 = vld [vmem:[#allocation7 + $0x18] sm:$0xff]  ;;  %v69_v1 = vld [vmem:[#allocation7 + $0x10] sm:$0xff]  ;;  %vm75_vm0 = vcmask 261120   ;;  %s855_s5 = smov 88  }
   0xf   :  { %94 = vmatpush.msra.mxu0 %v70_v0  ;;  %v68_v2 = vld [vmem:[#allocation7 + $0x8] sm:$0xff]  ;;  %v67_v3 = vld [vmem:[#allocation7] sm:$0xff]  ;;  %s856_s6 = smov 96   ;;  %s857_s7 = smov 120   ;;  %vm113_vm1 = vcmask 64512   ;;  %v937_v21 = vld [vmem:[#allocation5] sm:$0xff] }
  0x10   :  { %v65_v4 = vld [vmem:[#allocation2] sm:$0xff]  ;;  %v66_v5 = vld [vmem:[#allocation2 + $0x8] sm:$0xff]  ;;  %s858_s8 = smov 72   ;;  %s860_s9 = smov 80   ;;  %vm145_vm2 = vcmask 130048   ;;  %v941_v25 = vld [vmem:[#allocation5 + $0x8] sm:$0xff] }
  0x11   :  { %95 = vmatpush.msra.mxu0 %v69_v1  ;;  %v715_v6 = vld [vmem:[%s1054_s3] ss:$0 sm:$0xff]  ;;  %s859_s3 = smov 64   ;;  %s861_s10 = smov 112  }
  0x12   :  { %s862_s11 = smov 104   ;;  %s863_s12 = smov 56  }
  0x13   :  { %96 = vmatpush.msra.mxu0 %v68_v2  ;;  %s864_s13 = smov 40   ;;  %s865_s14 = smov 48  }
  0x14   :  { %s866_s15 = smov 16   ;;  %s867_s16 = smov 24  }
  0x15   :  { %97 = vmatpush.msra.mxu0 %v67_v3  ;;  %s868_s17 = smov [#allocation8]   ;;  %s634_s21 = sshll.u32 %s1055_s4, 4  ;;  %s635_s21 = int_to_ptr.hbm [resolvable:$true] %s634_s21 }
  0x16   :  { %648 = vmatmul.msk.f32.vlgmr.msra.gmra.mxu0 %vm75_vm0, %v65_v4  ;;  %s632_s18 = sshll.u32 %s868_s17, 4  ;;  %s633_s18 = int_to_ptr.vmem [resolvable:$true] %s632_s18 }
  0x1e   :  { %649 = vmatmul.msk.f32.gmra.mxu0 %vm75_vm0, %v66_v5 }
  0x93   :  { %v99_v7 = vpop.f32.mrf.mxu0 }
  0x94   :  { %v100_v8 = vadd.f32 %v715_v6, %v99_v7 }
  0x96   :  { %233 = vrot.lane.b32.xlu2 %v100_v8, %s855_s5 }
  0x9b   :  { %v102_v9 = vpop.f32.mrf.mxu0 }
  0x9c   :  { %v918_v10 = vadd.f32 %v715_v6, %v102_v9 }
  0x9e   :  { %111 = vrot.lane.b32.xlu0 %v918_v10, %s856_s6  ;;  %v925_v11 = vpack.i.bf16 %v100_v8, %v918_v10 }
  0xa6   :  { %109 = vrot.lane.b32.xlu0 %v100_v8, %s856_s6 }
  0xae   :  { %229 = vrot.lane.b32.xlu0 %v100_v8, %s857_s7 }
  0xb6   :  { %231 = vrot.lane.b32.xlu0 %v918_v10, %s857_s7 }
  0xbe   :  { %479 = vrot.lane.b32.xlu0 %v918_v10, %s858_s8 }
  0xc6   :  { %696 = vrot.lane.b32.xlu0 %v925_v11, %s859_s3 }
  0xce   :  { %357 = vrot.lane.b32.xlu0 %v918_v10, %s860_s9 }
  0xd6   :  { %351 = vrot.lane.b32.xlu0 %v100_v8, %s861_s10 }
  0xf0   :  { %v234_v35 = vpop.permute.xlu2 %233 }
 0x110   :  { %v112_v12 = vpop.permute.xlu0 %111 }
 0x111   :  { %650 = vmatpush.xpose.msk.msra.mxu1 %vm113_vm1, %v112_v12 }
 0x118   :  { %v110_v13 = vpop.permute.xlu0 %109 }
 0x119   :  { %651 = vmatpush.xpose.msk.msra.mxu1 %vm113_vm1, %v110_v13 }
 0x11c   :  { %652 = vmatmul.msk.f32.vlgmr.msra.gmra.mxu1 %vm113_vm1, %v100_v8 }
 0x120   :  { %v230_v14 = vpop.permute.xlu0 %229 }
 0x124   :  { %653 = vmatmul.msk.f32.gmra.mxu1 %vm113_vm1, %v918_v10 }
 0x128   :  { %v232_v15 = vpop.permute.xlu0 %231 }
 0x130   :  { %v480_v16 = vpop.permute.xlu0 %479 }
 0x138   :  { %v697_v17 = vpop.permute.xlu0 %696 }
 0x139   :  { %v698_v18 = vunpack.i.l.bf16 %v697_v17  ;;  %v699_v19 = vunpack.i.h.bf16 %v697_v17 }
 0x13b   :  { %220 = vmatpush.msrb.mxu0 %v698_v18  ;;  %674 = vmatpush.msra.mxu2 %v698_v18 }
 0x13d   :  { %221 = vmatpush.msrb.mxu0 %v699_v19  ;;  %675 = vmatpush.msra.mxu2 %v699_v19 }
 0x140   :  { %v358_v20 = vpop.permute.xlu0 %357 }
 0x141   :  { %662 = vmatpush.xpose.msk.msra.mxu0 %vm113_vm1, %v358_v20 }
 0x148   :  { %v352_v52 = vpop.permute.xlu0 %351 }
 0x199   :  { %v139_v22 = vpop.f32.mrf.mxu1 }
 0x19a   :  { %v140_v23 = vadd.f32 %v139_v22, %v937_v21 }
 0x19c   :  { %v146_v24 = vsel %vm145_vm2, %v140_v23, -inf }
 0x19d   :  { %147 = vmax.xlane.f32.xlu1 %v146_v24 }
 0x1a1   :  { %v142_v26 = vpop.f32.mrf.mxu1 }
 0x1a2   :  { %v944_v27 = vadd.f32 %v142_v26, %v941_v25 }
 0x1a4   :  { %v149_v28 = vsel %vm145_vm2, %v944_v27, -inf }
 0x1a5   :  { %150 = vmax.xlane.f32.xlu0 %v149_v28 }
 0x1b6   :  { %235 = vrot.lane.b32.xlu1 %v918_v10, %s855_s5 }
 0x1be   :  { %477 = vrot.lane.b32.xlu1 %v100_v8, %s858_s8 }
 0x1c6   :  { %473 = vrot.lane.b32.xlu1 %v100_v8, %s862_s11 }
 0x1ce   :  { %355 = vrot.lane.b32.xlu1 %v100_v8, %s860_s9 }
 0x1d6   :  { %353 = vrot.lane.b32.xlu1 %v918_v10, %s861_s10 }
 0x210   :  { %v148_v29 = vpop.xlane.xlu1 %147 }
 0x211   :  { %v152_v30 = vsub.f32 %v140_v23, %v148_v29 }
 0x213   :  { %v154_v31 = vmul.f32 1.442695, %v152_v30 }
 0x215   :  { %716 = vpow2.f32 %v154_v31 }
 0x218   :  { %v151_v2 = vpop.xlane.xlu0 %150 }
 0x219   :  { %v153_v4 = vsub.f32 %v944_v27, %v151_v2 }
 0x21b   :  { %v717_v32 = vpop.eup %716  ;;  %v156_v5 = vmul.f32 1.442695, %v153_v4 }
 0x21c   :  { %v158_v33 = vsel %vm145_vm2, %v717_v32, 0.0 }
 0x21d   :  { %159 = vadd.xlane.f32.xlu2 %v158_v33 }
 0x228   :  { %v236_v34 = vpop.permute.xlu1 %235 }
 0x229   :  { %656 = vmatpush.xpose.msk.msra.mxu3 %vm113_vm1, %v236_v34 }
 0x22d   :  { %657 = vmatpush.xpose.msk.msra.mxu3 %vm113_vm1, %v234_v35 }
 0x230   :  { %v478_v36 = vpop.permute.xlu1 %477  ;;  %658 = vmatmul.msk.f32.vlgmr.msra.gmra.mxu3 %vm113_vm1, %v230_v14 }
 0x231   :  { %668 = vmatpush.xpose.msk.msrb.mxu3 %vm113_vm1, %v480_v16 }
 0x235   :  { %669 = vmatpush.xpose.msk.msrb.mxu3 %vm113_vm1, %v478_v36  ;;  %475 = vrot.lane.b32.xlu2 %v918_v10, %s862_s11 }
 0x238   :  { %v474_v37 = vpop.permute.xlu1 %473  ;;  %659 = vmatmul.msk.f32.gmra.mxu3 %vm113_vm1, %v232_v15 }
 0x240   :  { %v356_v38 = vpop.permute.xlu1 %355  ;;  %670 = vmatmul.msk.f32.vlgmr.msrb.gmra.mxu3 %vm113_vm1, %v474_v37 }
 0x241   :  { %663 = vmatpush.xpose.msk.msra.mxu0 %vm113_vm1, %v356_v38 }
 0x248   :  { %v354_v53 = vpop.permute.xlu1 %353 }
 0x290   :  { %v160_v39 = vpop.xlane.xlu2 %159 }
 0x291   :  { %718 = vrcp.f32 %v160_v39  ;;  %v175_v44 = vand.u32 2147483648, %v160_v39  ;;  %v173_v46 = vand.u32 2147483647, %v160_v39  ;;  %vm169_vm4 = vweird.f32 %v160_v39 }
 0x292   :  { %720 = vpow2.f32 %v156_v5 }
 0x293   :  { %v176_v48 = vor.u32 1.1754944e-38, %v175_v44  ;;  %vm174_vm6 = vcmp.eq.f32.partialorder %v173_v46, 8.507059e+37 }
 0x297   :  { %v719_v40 = vpop.eup %718 }
 0x298   :  { %v165_v41 = vmul.f32 %v719_v40, %v160_v39  ;;  %v476_v42 = vpop.permute.xlu2 %475  ;;  %vm170_vm3 = vweird.f32 %v719_v40  ;;  %v981_v13 = vpop.eup %720 }
 0x299   :  { %671 = vmatmul.msk.f32.gmra.mxu3 %vm113_vm1, %v476_v42  ;;  %vm171_vm5 = vmor %vm169_vm4, %vm170_vm3  ;;  %v161_v19 = vsel %vm145_vm2, %v981_v13, 0.0 }
 0x29a   :  { %v166_v43 = vsub.f32 1.0, %v165_v41 }
 0x29c   :  { %v167_v45 = vmul.f32 %v719_v40, %v166_v43 }
 0x29e   :  { %v168_v47 = vadd.f32 %v719_v40, %v167_v45 }
 0x2a0   :  { %v172_v49 = vsel %vm171_vm5, %v719_v40, %v168_v47 }
 0x2a1   :  { %v177_v50 = vsel %vm174_vm6, %v176_v48, %v172_v49 }
 0x2a2   :  { %v178_v51 = vmul.f32 %v717_v32, %v177_v50 }
 0x2a4   :  { %654 = vmatmul.msk.f32.vlgmr.msrb.gmra.mxu0 %vm145_vm2, %v178_v51 }
 0x2ac   :  { %664 = vmatmul.msk.f32.vlgmr.msra.gmra.mxu0 %vm113_vm1, %v352_v52 }
 0x2b3   :  { %v262_v54 = vpop.f32.mrf.mxu3 }
 0x2b4   :  { %v263_v55 = vadd.f32 %v262_v54, %v937_v21  ;;  %665 = vmatmul.msk.f32.gmra.mxu0 %vm113_vm1, %v354_v53 }
 0x2b6   :  { %v268_v56 = vsel %vm145_vm2, %v263_v55, -inf }
 0x2b7   :  { %269 = vmax.xlane.f32.xlu1 %v268_v56 }
 0x2bb   :  { %v265_v57 = vpop.f32.mrf.mxu3 }
 0x2bc   :  { %v266_v58 = vadd.f32 %v265_v57, %v941_v25 }
 0x2be   :  { %v271_v59 = vsel %vm145_vm2, %v266_v58, -inf }
 0x2bf   :  { %272 = vmax.xlane.f32.xlu2 %v271_v59 }
 0x2c3   :  { %v506_v60 = vpop.f32.mrf.mxu3 }
 0x2c4   :  { %v507_v61 = vadd.f32 %v506_v60, %v937_v21 }
 0x2c6   :  { %v512_v62 = vsel %vm145_vm2, %v507_v61, -inf }
 0x2c7   :  { %513 = vmax.xlane.f32.xlu0 %v512_v62 }
 0x31c   :  { %v509_v63 = vpop.f32.mrf.mxu3 }
 0x31d   :  { %v510_v0 = vadd.f32 %v509_v63, %v941_v25 }
 0x31f   :  { %v515_v1 = vsel %vm145_vm2, %v510_v0, -inf }
 0x320   :  { %516 = vmax.xlane.f32.xlu0 %v515_v1 }
 0x321   :  { %v976_v3 = vpop.f32.mrf.mxu0 }
 0x329   :  { %v384_v6 = vpop.f32.mrf.mxu0 }
 0x32a   :  { %v385_v7 = vadd.f32 %v384_v6, %v937_v21  ;;  %v270_v8 = vpop.xlane.xlu1 %269 }
 0x32b   :  { %v274_v9 = vsub.f32 %v263_v55, %v270_v8 }
 0x32c   :  { %v390_v10 = vsel %vm145_vm2, %v385_v7, -inf }
 0x32d   :  { %v276_v12 = vmul.f32 1.442695, %v274_v9  ;;  %391 = vmax.xlane.f32.xlu1 %v390_v10 }
 0x32f   :  { %722 = vpow2.f32 %v276_v12 }
 0x331   :  { %v387_v14 = vpop.f32.mrf.mxu0 }
 0x332   :  { %v388_v15 = vadd.f32 %v387_v14, %v941_v25  ;;  %v273_v16 = vpop.xlane.xlu2 %272 }
 0x333   :  { %v275_v17 = vsub.f32 %v266_v58, %v273_v16 }
 0x334   :  { %v393_v18 = vsel %vm145_vm2, %v388_v15, -inf }
 0x335   :  { %v987_v20 = vpop.eup %722  ;;  %v278_v21 = vmul.f32 1.442695, %v275_v17  ;;  %394 = vmax.xlane.f32.xlu2 %v393_v18  ;;  %162 = vadd.xlane.f32.xlu1 %v161_v19 }
 0x336   :  { %v280_v22 = vsel %vm145_vm2, %v987_v20, 0.0 }
 0x337   :  { %724 = vpow2.f32 %v278_v21  ;;  %281 = vadd.xlane.f32.xlu0 %v280_v22 }
 0x33a   :  { %v514_v23 = vpop.xlane.xlu0 %513 }
 0x33b   :  { %v518_v24 = vsub.f32 %v507_v61, %v514_v23 }
 0x33d   :  { %v991_v25 = vpop.eup %724  ;;  %v520_v26 = vmul.f32 1.442695, %v518_v24 }
 0x33e   :  { %v283_v27 = vsel %vm145_vm2, %v991_v25, 0.0 }
 0x33f   :  { %726 = vpow2.f32 %v520_v26  ;;  %284 = vadd.xlane.f32.xlu2 %v283_v27 }
 0x345   :  { %v995_v28 = vpop.eup %726 }
 0x346   :  { %v524_v29 = vsel %vm145_vm2, %v995_v28, 0.0 }
 0x347   :  { %525 = vadd.xlane.f32.xlu1 %v524_v29 }
 0x34b   :  { %701 = vrot.lane.b32.xlu0 %v925_v11, %s863_s12 }
 0x393   :  { %v517_v30 = vpop.xlane.xlu0 %516 }
 0x394   :  { %v519_v31 = vsub.f32 %v510_v0, %v517_v30 }
 0x396   :  { %v522_v32 = vmul.f32 1.442695, %v519_v31 }
 0x398   :  { %728 = vpow2.f32 %v522_v32 }
 0x39e   :  { %v1000_v33 = vpop.eup %728 }
 0x39f   :  { %v527_v34 = vsel %vm145_vm2, %v1000_v33, 0.0 }
 0x3a0   :  { %528 = vadd.xlane.f32.xlu1 %v527_v34  ;;  %v392_v35 = vpop.xlane.xlu1 %391 }
 0x3a1   :  { %v396_v36 = vsub.f32 %v385_v7, %v392_v35 }
 0x3a3   :  { %v398_v37 = vmul.f32 1.442695, %v396_v36 }
 0x3a5   :  { %730 = vpow2.f32 %v398_v37 }
 0x3a8   :  { %v395_v38 = vpop.xlane.xlu2 %394  ;;  %v163_v39 = vpop.xlane.xlu1 %162 }
 0x3a9   :  { %v397_v40 = vsub.f32 %v388_v15, %v395_v38  ;;  %732 = vrcp.f32 %v163_v39  ;;  %v190_v52 = vand.u32 2147483648, %v163_v39  ;;  %v188_v53 = vand.u32 2147483647, %v163_v39 }
 0x3aa   :  { %v282_v41 = vpop.xlane.xlu0 %281  ;;  %vm184_vm8 = vweird.f32 %v163_v39 }
 0x3ab   :  { %v1004_v42 = vpop.eup %730  ;;  %v400_v43 = vmul.f32 1.442695, %v397_v40  ;;  %734 = vrcp.f32 %v282_v41  ;;  %v191_v59 = vor.u32 1.1754944e-38, %v190_v52  ;;  %vm189_vm11 = vcmp.eq.f32.partialorder %v188_v53, 8.507059e+37 }
 0x3ac   :  { %v402_v44 = vsel %vm145_vm2, %v1004_v42, 0.0  ;;  %v297_v63 = vand.u32 2147483648, %v282_v41  ;;  %vm291_vm12 = vweird.f32 %v282_v41  ;;  %v295_v1 = vand.u32 2147483647, %v282_v41 }
 0x3ad   :  { %736 = vpow2.f32 %v400_v43  ;;  %403 = vadd.xlane.f32.xlu2 %v402_v44 }
 0x3ae   :  { %v298_v7 = vor.u32 1.1754944e-38, %v297_v63  ;;  %vm296_vm14 = vcmp.eq.f32.partialorder %v295_v1, 8.507059e+37 }
 0x3af   :  { %v733_v45 = vpop.eup %732 }
 0x3b0   :  { %v180_v46 = vmul.f32 %v733_v45, %v163_v39  ;;  %vm185_vm7 = vweird.f32 %v733_v45 }
 0x3b1   :  { %v735_v47 = vpop.eup %734  ;;  %vm186_vm9 = vmor %vm184_vm8, %vm185_vm7 }
 0x3b2   :  { %v181_v48 = vsub.f32 1.0, %v180_v46  ;;  %v287_v49 = vmul.f32 %v735_v47, %v282_v41  ;;  %v285_v50 = vpop.xlane.xlu2 %284  ;;  %vm292_vm10 = vweird.f32 %v735_v47 }
 0x3b3   :  { %v1008_v51 = vpop.eup %736  ;;  %738 = vrcp.f32 %v285_v50  ;;  %vm293_vm13 = vmor %vm291_vm12, %vm292_vm10  ;;  %v312_v16 = vand.u32 2147483648, %v285_v50  ;;  %vm306_vm3 = vweird.f32 %v285_v50  ;;  %v310_v17 = vand.u32 2147483647, %v285_v50 }
 0x3b4   :  { %v182_v54 = vmul.f32 %v733_v45, %v181_v48  ;;  %v288_v55 = vsub.f32 1.0, %v287_v49  ;;  %v405_v56 = vsel %vm145_vm2, %v1008_v51, 0.0 }
 0x3b5   :  { %406 = vadd.xlane.f32.xlu2 %v405_v56  ;;  %v313_v19 = vor.u32 1.1754944e-38, %v312_v16  ;;  %vm311_vm5 = vcmp.eq.f32.partialorder %v310_v17, 8.507059e+37 }
 0x3b6   :  { %v289_v57 = vmul.f32 %v735_v47, %v288_v55  ;;  %v183_v58 = vadd.f32 %v733_v45, %v182_v54 }
 0x3b8   :  { %v290_v60 = vadd.f32 %v735_v47, %v289_v57  ;;  %v187_v61 = vsel %vm186_vm9, %v733_v45, %v183_v58 }
 0x3b9   :  { %v739_v62 = vpop.eup %738  ;;  %706 = vrot.lane.b32.xlu1 %v925_v11, %s864_s13  ;;  %v192_v0 = vsel %vm189_vm11, %v191_v59, %v187_v61 }
 0x3ba   :  { %v302_v2 = vmul.f32 %v739_v62, %v285_v50  ;;  %v193_v4 = vmul.f32 %v981_v13, %v192_v0  ;;  %v294_v6 = vsel %vm293_vm13, %v735_v47, %v290_v60  ;;  %vm307_vm15 = vweird.f32 %v739_v62  ;;  %v526_v23 = vpop.xlane.xlu1 %525 }
 0x3bb   :  { %v299_v12 = vsel %vm296_vm14, %v298_v7, %v294_v6  ;;  %vm308_vm4 = vmor %vm306_vm3, %vm307_vm15  ;;  %740 = vrcp.f32 %v526_v23  ;;  %v541_v35 = vand.u32 2147483648, %v526_v23  ;;  %vm535_vm7 = vweird.f32 %v526_v23 }
 0x3bc   :  { %v303_v5 = vsub.f32 1.0, %v302_v2  ;;  %655 = vmatmul.msk.f32.vlgmr.msra.gmra.mxu2 %vm145_vm2, %v193_v4  ;;  %v300_v13 = vmul.f32 %v987_v20, %v299_v12  ;;  %v539_v36 = vand.u32 2147483647, %v526_v23 }
 0x3bd   :  { %v702_v8 = vpop.permute.xlu0 %701  ;;  %v542_v41 = vor.u32 1.1754944e-38, %v541_v35 }
 0x3be   :  { %v304_v9 = vmul.f32 %v739_v62, %v303_v5  ;;  %v703_v10 = vunpack.i.l.bf16 %v702_v8  ;;  %v704_v14 = vunpack.i.h.bf16 %v702_v8  ;;  %vm540_vm9 = vcmp.eq.f32.partialorder %v539_v36, 8.507059e+37 }
 0x3c0   :  { %342 = vmatpush.msrb.mxu2 %v703_v10  ;;  %v305_v15 = vadd.f32 %v739_v62, %v304_v9 }
 0x3c1   :  { %v741_v26 = vpop.eup %740 }
 0x3c2   :  { %343 = vmatpush.msrb.mxu2 %v704_v14  ;;  %v309_v18 = vsel %vm308_vm4, %v739_v62, %v305_v15  ;;  %v531_v20 = vmul.f32 %v741_v26, %v526_v23  ;;  %vm536_vm6 = vweird.f32 %v741_v26 }
 0x3c3   :  { %v314_v21 = vsel %vm311_vm5, %v313_v19, %v309_v18  ;;  %vm537_vm8 = vmor %vm535_vm7, %vm536_vm6 }
 0x3c4   :  { %660 = vmatmul.msk.f32.vlgmr.msrb.gmra.mxu2 %vm145_vm2, %v300_v13  ;;  %v315_v22 = vmul.f32 %v991_v25, %v314_v21  ;;  %v532_v27 = vsub.f32 1.0, %v531_v20 }
 0x3c6   :  { %v533_v30 = vmul.f32 %v741_v26, %v532_v27 }
 0x3c8   :  { %v534_v34 = vadd.f32 %v741_v26, %v533_v30 }
 0x3cc   :  { %661 = vmatmul.msk.f32.gmra.mxu2 %vm145_vm2, %v315_v22 }
 0x3cd   :  { %711 = vrot.lane.b32.xlu2 %v925_v11, %s865_s14  ;;  %v538_v11 = vsel %vm537_vm8, %v741_v26, %v534_v34 }
 0x3ce   :  { %v543_v44 = vsel %vm540_vm9, %v542_v41, %v538_v11  ;;  %vm623_vm9 = vcmask 195584  }
 0x3cf   :  { %v544_v59 = vmul.f32 %v995_v28, %v543_v44 }
 0x413   :  { %v529_v24 = vpop.xlane.xlu1 %528 }
 0x414   :  { %742 = vrcp.f32 %v529_v24  ;;  %vm550_vm12 = vweird.f32 %v529_v24  ;;  %v556_v52 = vand.u32 2147483648, %v529_v24  ;;  %v554_v56 = vand.u32 2147483647, %v529_v24 }
 0x416   :  { %v557_v0 = vor.u32 1.1754944e-38, %v556_v52  ;;  %vm555_vm4 = vcmp.eq.f32.partialorder %v554_v56, 8.507059e+37 }
 0x41a   :  { %v743_v29 = vpop.eup %742 }
 0x41b   :  { %v546_v31 = vmul.f32 %v743_v29, %v529_v24  ;;  %vm551_vm10 = vweird.f32 %v743_v29 }
 0x41c   :  { %vm1020_vm14 = vmor %vm550_vm12, %vm551_vm10 }
 0x41d   :  { %v547_v25 = vsub.f32 1.0, %v546_v31 }
 0x41f   :  { %v548_v38 = vmul.f32 %v743_v29, %v547_v25 }
 0x420   :  { %v404_v32 = vpop.xlane.xlu2 %403 }
 0x421   :  { %744 = vrcp.f32 %v404_v32  ;;  %v417_v45 = vand.u32 2147483647, %v404_v32  ;;  %v419_v46 = vand.u32 2147483648, %v404_v32  ;;  %v549_v50 = vadd.f32 %v743_v29, %v548_v38 }
 0x422   :  { %vm413_vm13 = vweird.f32 %v404_v32 }
 0x423   :  { %v420_v58 = vor.u32 1.1754944e-38, %v419_v46  ;;  %vm418_vm3 = vcmp.eq.f32.partialorder %v417_v45, 8.507059e+37  ;;  %v553_v63 = vsel %vm1020_vm14, %v743_v29, %v549_v50 }
 0x424   :  { %v558_v7 = vsel %vm555_vm4, %v557_v0, %v553_v63 }
 0x425   :  { %v559_v14 = vmul.f32 %v1000_v33, %v558_v7 }
 0x427   :  { %v745_v37 = vpop.eup %744 }
 0x428   :  { %v409_v39 = vmul.f32 %v745_v37, %v404_v32  ;;  %v407_v40 = vpop.xlane.xlu2 %406  ;;  %vm414_vm11 = vweird.f32 %v745_v37 }
 0x429   :  { %746 = vrcp.f32 %v407_v40  ;;  %vm415_vm15 = vmor %vm413_vm13, %vm414_vm11  ;;  %v434_v5 = vand.u32 2147483648, %v407_v40  ;;  %v432_v9 = vand.u32 2147483647, %v407_v40  ;;  %vm428_vm6 = vweird.f32 %v407_v40 }
 0x42a   :  { %v410_v43 = vsub.f32 1.0, %v409_v39 }
 0x42b   :  { %v707_v47 = vpop.permute.xlu1 %706  ;;  %v435_v12 = vor.u32 1.1754944e-38, %v434_v5  ;;  %vm433_vm8 = vcmp.eq.f32.partialorder %v432_v9, 8.507059e+37 }
 0x42c   :  { %v411_v48 = vmul.f32 %v745_v37, %v410_v43  ;;  %v708_v49 = vunpack.i.l.bf16 %v707_v47  ;;  %v709_v54 = vunpack.i.h.bf16 %v707_v47 }
 0x42e   :  { %v412_v53 = vadd.f32 %v745_v37, %v411_v48  ;;  %586 = vmatpush.msra.mxu2 %v708_v49 }
 0x42f   :  { %v747_v57 = vpop.eup %746 }
 0x430   :  { %v424_v60 = vmul.f32 %v747_v57, %v407_v40  ;;  %v712_v61 = vpop.permute.xlu2 %711  ;;  %587 = vmatpush.msra.mxu2 %v709_v54  ;;  %v416_v62 = vsel %vm415_vm15, %v745_v37, %v412_v53  ;;  %vm429_vm5 = vweird.f32 %v747_v57 }
 0x431   :  { %672 = vmatmul.msk.f32.vlgmr.msra.gmra.mxu2 %vm145_vm2, %v544_v59  ;;  %v713_v1 = vunpack.i.l.bf16 %v712_v61  ;;  %v421_v2 = vsel %vm418_vm3, %v420_v58, %v416_v62  ;;  %v714_v6 = vunpack.i.h.bf16 %v712_v61  ;;  %vm430_vm7 = vmor %vm428_vm6, %vm429_vm5 }
 0x432   :  { %v425_v4 = vsub.f32 1.0, %v424_v60  ;;  %v422_v8 = vmul.f32 %v1004_v42, %v421_v2 }
 0x433   :  { %464 = vmatpush.msrb.mxu1 %v713_v1 }
 0x434   :  { %v426_v28 = vmul.f32 %v747_v57, %v425_v4 }
 0x435   :  { %465 = vmatpush.msrb.mxu1 %v714_v6 }
 0x436   :  { %666 = vmatmul.msk.f32.vlgmr.msrb.gmra.mxu1 %vm145_vm2, %v422_v8  ;;  %v427_v10 = vadd.f32 %v747_v57, %v426_v28 }
 0x438   :  { %v431_v15 = vsel %vm430_vm7, %v747_v57, %v427_v10 }
 0x439   :  { %673 = vmatmul.msk.f32.gmra.mxu2 %vm145_vm2, %v559_v14  ;;  %v436_v16 = vsel %vm433_vm8, %v435_v12, %v431_v15 }
 0x43a   :  { %v437_v13 = vmul.f32 %v1008_v51, %v436_v16 }
 0x43e   :  { %667 = vmatmul.msk.f32.gmra.mxu1 %vm145_vm2, %v437_v13 }
 0x43f   :  { %v226_v42 = vpop.f32.mrf.mxu2 }
 0x447   :  { %v345_v17 = vpop.f32.mrf.mxu2 }
 0x448   :  { %597 = vrot.lane.b32.xlu0 %v345_v17, %s852_s24 }
 0x44f   :  { %v348_v18 = vpop.f32.mrf.mxu2 }
 0x450   :  { %599 = vrot.lane.b32.xlu0 %v348_v18, %s852_s24 }
 0x4b3   :  { %v467_v19 = vpop.f32.mrf.mxu1 }
 0x4b4   :  { %605 = vrot.lane.b32.xlu1 %v467_v19, %s866_s15  ;;  %v589_v33 = vpop.f32.mrf.mxu2 }
 0x4b5   :  { %613 = vrot.lane.b32.xlu2 %v589_v33, %s867_s16 }
 0x4ba   :  { %v598_v51 = vpop.permute.xlu0 %597 }
 0x4bb   :  { %v470_v21 = vpop.f32.mrf.mxu1  ;;  %v619_v23 = vsel %vm113_vm1, %v976_v3, %v598_v51 }
 0x4bc   :  { %607 = vrot.lane.b32.xlu0 %v470_v21, %s866_s15  ;;  %v592_v22 = vpop.f32.mrf.mxu2 }
 0x4bd   :  { %615 = vrot.lane.b32.xlu1 %v592_v22, %s867_s16 }
 0x4c2   :  { %v600_v24 = vpop.permute.xlu0 %599 }
 0x4c3   :  { %v620_v30 = vsel %vm113_vm1, %v226_v42, %v600_v24 }
 0x50f   :  { %v614_v20 = vpop.permute.xlu2 %613 }
 0x526   :  { %v606_v26 = vpop.permute.xlu1 %605 }
 0x527   :  { %v621_v27 = vsel %vm145_vm2, %v619_v23, %v606_v26 }
 0x528   :  { %v624_v29 = vsel %vm623_vm9, %v621_v27, %v614_v20 }
 0x529   :  { %626 = vst.msk [vmem:[#allocation8] sm:$0xff] %vm75_vm0, %v624_v29 }
 0x52e   :  { %v608_v31 = vpop.permute.xlu0 %607 }
 0x52f   :  { %v622_v3 = vsel %vm145_vm2, %v620_v30, %v608_v31  ;;  %v616_v32 = vpop.permute.xlu1 %615 }
 0x530   :  { %v625_v34 = vsel %vm623_vm9, %v622_v3, %v616_v32 }
 0x531   :  { %627 = vst.msk [vmem:[#allocation8 + $0x8] sm:$0xff] %vm75_vm0, %v625_v34 }
 0x532   :  { %640 = dma.vmem_to_hbm [thread:$0]  %s633_s18, 256, %s635_s21, [#allocation4], %s851_s23, %s851_s23, %s852_s24  }
 0x533   :  { %848 = dma.done.wait [#allocation4], 256  }
 0x534   :  { %849 = vsyncadd [#allocation4], 4294967040 }
 0x535   :  { %645 = vsyncpa [#allocation3], 1 }
 0x536   :  { %646 = vsyncpa [#allocation6], 1 }
 0x537   :  { %647 = vsyncpa [#allocation4], 1 }

</bundles_post_ra>
